<compile_context>
chip_gen: v5e
topology: v5e:2x2
jax: 0.10.0
libtpu: 0.0.40
codegen_flags: <defaults>
</compile_context>

<pallas_src>
import functools

import jax
import jax.numpy as jnp
import numpy as np
from jax.experimental import pallas as pl
from jax.experimental.pallas import tpu as pltpu


# -----------------------------------------------------------------------------
# Pallas kernel: one grid step == G graphs.
# -----------------------------------------------------------------------------
def attn_readout_kernel(
    feat_ref,   # VMEM (G, M, D)  raw (pre-BN) node features
    nn_ref,     # VMEM (G, 1)     int32 valid-node count per graph
    bias_ref,   # VMEM (G, H)     per-graph bias = shift@Wu + fc_v(intend) + fc_i(bn(feat[last]))
    wu_ref,     # VMEM (D, H)     BN-folded fc_u weight (scale * Wu)
    we_ref,     # VMEM (1, H)     fc_e weight (no bias)
    out_ref,    # VMEM (G, D)     raw (pre-BN) attention readout per graph
):
    G, M, D = feat_ref.shape
    H = wu_ref.shape[1]

    feat = feat_ref[...]                                           # (G, M, D)

    # ---- fc_u over all G*M nodes in one MXU matmul (BN folded in) -----------
    u = jnp.dot(feat.reshape(G * M, D), wu_ref[...],
                preferred_element_type=jnp.float32)                # (G*M, H)
    u = u.reshape(G, M, H)

    # ---- sigmoid(fc_u + fc_v(intend) + fc_i(bn(feat[last]))) ----------------
    sig = jax.nn.sigmoid(u + bias_ref[...][:, None, :])            # (G, M, H)

    # ---- fc_e (bias-free): e[g, m] = <sig[g, m, :], we> ----------------------
    e = jnp.sum(sig * we_ref[...], axis=-1)                        # (G, M)

    # ---- segment softmax over the valid nodes of each graph ------------------
    node_ids = jax.lax.broadcasted_iota(jnp.int32, (G, M), 1)      # (G, M)
    valid = node_ids < nn_ref[...]                                 # (G, M)
    e = jnp.where(valid, e, -1e30)
    e_max = jnp.max(e, axis=-1, keepdims=True)                     # (G, 1)
    p = jnp.where(valid, jnp.exp(e - e_max), 0.0)                  # (G, M)
    denom = jnp.maximum(jnp.sum(p, axis=-1, keepdims=True), 1e-30)  # empty-graph guard
    alpha = p * pl.reciprocal(denom, approx=False)                 # (G, M)

    # ---- weighted readout in raw feature space (lane bcast * sublane reduce) --
    rst = jnp.sum(alpha[:, :, None].astype(feat.dtype) * feat, axis=1)  # (G, D)
    out_ref[...] = rst.astype(out_ref.dtype)


# -----------------------------------------------------------------------------
# Wrapper: hoisted batched XLA matmuls + Pallas call.
# -----------------------------------------------------------------------------
@functools.partial(jax.jit, static_argnames=("graphs_per_step",))
def attn_readout(feat_padded, intend, last_local, num_nodes, params,
                 graphs_per_step=16):
    B, M, D = feat_padded.shape
    H = params["wu"].shape[1]
    G = graphs_per_step
    if G % 8 != 0:
        raise ValueError("graphs_per_step must be a multiple of 8")

    eps = 1e-5
    bn_scale = params["bn_gamma"] / jnp.sqrt(params["bn_var"] + eps)   # (D,)
    bn_shift = params["bn_beta"] - params["bn_mean"] * bn_scale        # (D,)

    # Fold BN affine into fc_u:  bn(x) @ Wu == x @ (scale * Wu) + shift @ Wu
    wu_folded = bn_scale[:, None] * params["wu"]                       # (D, H)
    bu = bn_shift @ params["wu"]                                       # (H,)

    # Hoisted batched matmuls: fc_v(intend) and fc_i(bn(feat[last_node])).
    last_feat = feat_padded[jnp.arange(B), last_local.astype(jnp.int32)]  # (B, D)
    last_feat_bn = last_feat * bn_scale + bn_shift
    bias = (bu[None, :]
            + intend @ params["wv"] + params["bv"][None, :]
            + last_feat_bn @ params["wi"] + params["bi"][None, :])     # (B, H)

    # Pad the batch to a multiple of G graphs per grid step.
    B_pad = ((B + G - 1) // G) * G
    pad = B_pad - B
    feat_p = jnp.pad(feat_padded, ((0, pad), (0, 0), (0, 0)))
    bias_p = jnp.pad(bias, ((0, pad), (0, 0)))
    nn_p = jnp.pad(num_nodes.astype(jnp.int32), ((0, pad),)).reshape(B_pad, 1)

    grid_spec = pl.GridSpec(
        grid=(B_pad // G,),
        in_specs=[
            pl.BlockSpec((G, M, D), lambda i: (i, 0, 0)),   # feat
            pl.BlockSpec((G, 1), lambda i: (i, 0)),         # num_nodes
            pl.BlockSpec((G, H), lambda i: (i, 0)),         # per-graph bias
            pl.BlockSpec((D, H), lambda i: (0, 0)),         # folded Wu
            pl.BlockSpec((1, H), lambda i: (0, 0)),         # We
        ],
        out_specs=pl.BlockSpec((G, D), lambda i: (i, 0)),
    )

    rst_raw = pl.pallas_call(
        attn_readout_kernel,
        out_shape=jax.ShapeDtypeStruct((B_pad, D), jnp.float32),
        grid_spec=grid_spec,
        compiler_params=pltpu.CompilerParams(
            dimension_semantics=("parallel",),
            vmem_limit_bytes=32 * 1024 * 1024),
    )(feat_p, nn_p, bias_p, wu_folded, params["we"].reshape(1, H))
    rst_raw = rst_raw[:B]                                              # (B, D)

    # Fold the BN affine on the readout (valid since sum(alpha) == 1) directly
    # into fc_out:  (raw*scale + shift) @ Wout == raw @ (scale*Wout) + shift@Wout
    if params.get("wout") is not None:
        wout_eff = bn_scale[:, None] * params["wout"]                  # (D, O)
        bout_eff = bn_shift @ params["wout"]                           # (O,)
        return rst_raw @ wout_eff + bout_eff[None, :]                  # (B, O)
    return rst_raw * bn_scale + bn_shift                               # (B, D)


# -----------------------------------------------------------------------------
# Pure-JAX reference (unpadded, mirrors the PyTorch/DGL semantics)
# -----------------------------------------------------------------------------
def attn_readout_reference(feat, intend, last_nodes, num_nodes, params):
    eps = 1e-5
    f = ((feat - params["bn_mean"]) / jnp.sqrt(params["bn_var"] + eps)
         * params["bn_gamma"] + params["bn_beta"])
    feat_u = f @ params["wu"]                                     # [N, H]
    last_emb = f[last_nodes] @ params["wi"] + params["bi"]        # [B, H]
    feat_v = intend @ params["wv"] + params["bv"]                 # [B, H]

    B = intend.shape[0]
    outs, off = [], 0
    for b in range(B):
        n = int(num_nodes[b])
        sig = jax.nn.sigmoid(feat_u[off:off + n]
                             + feat_v[b][None, :]
                             + last_emb[b][None, :])              # [n, H]
        e = jnp.sum(sig * params["we"][None, :], axis=-1)         # [n]
        alpha = jax.nn.softmax(e)
        outs.append(jnp.sum(f[off:off + n] * alpha[:, None], axis=0))
        off += n
    rst = jnp.stack(outs)                                         # [B, D]
    return rst @ params["wout"]                                   # [B, O]


# -----------------------------------------------------------------------------
if __name__ == "__main__":
    B = 10              # graphs / sessions in the batch
    MAX_NODES = 8       # padded nodes per graph
    D = 32              # input_dim
    H = 32              # hidden_dim
    O = 16              # output_dim (!= input_dim -> fc_out is used)

    num_nodes_np = np.array([8, 5, 3, 8, 1, 7, 2, 6, 4, 8], dtype=np.int32)
    N_total = int(num_nodes_np.sum())
    offsets = np.concatenate([[0], np.cumsum(num_nodes_np)])[:-1]
    last_nodes_np = (offsets + num_nodes_np - 1).astype(np.int32)  # global idx
    last_local_np = (last_nodes_np - offsets).astype(np.int32)     # local idx

    key = jax.random.PRNGKey(0)
    keys = jax.random.split(key, 12)
    feat = jax.random.normal(keys[0], (N_total, D), jnp.float32)
    intend = jax.random.normal(keys[1], (B, D), jnp.float32)

    params = {
        "bn_gamma": 1.0 + 0.1 * jax.random.normal(keys[2], (D,), jnp.float32),
        "bn_beta": 0.1 * jax.random.normal(keys[3], (D,), jnp.float32),
        "bn_mean": 0.1 * jax.random.normal(keys[4], (D,), jnp.float32),
        "bn_var": 1.0 + 0.5 * jax.random.uniform(keys[5], (D,), jnp.float32),
        # Linear weights stored as [in, out] (PyTorch keeps [out, in]; y = x W^T).
        "wu": 0.1 * jax.random.normal(keys[6], (D, H), jnp.float32),
        "wv": 0.1 * jax.random.normal(keys[7], (D, H), jnp.float32),
        "bv": 0.1 * jax.random.normal(keys[8], (H,), jnp.float32),
        "wi": 0.1 * jax.random.normal(keys[9], (D, H), jnp.float32),
        "bi": 0.1 * jax.random.normal(keys[10], (H,), jnp.float32),
        "we": 0.1 * jax.random.normal(keys[11], (H,), jnp.float32),
        "wout": 0.1 * jax.random.normal(jax.random.PRNGKey(1), (D, O),
                                        jnp.float32),
    }

    # Pack feat into the padded per-graph layout [B, MAX_NODES, D].
    feat_padded = np.zeros((B, MAX_NODES, D), dtype=np.float32)
    for b in range(B):
        n = int(num_nodes_np[b])
        feat_padded[b, :n] = np.asarray(feat)[offsets[b]:offsets[b] + n]
    feat_padded = jnp.asarray(feat_padded)

    out = attn_readout(feat_padded, intend,
                       jnp.asarray(last_local_np),
                       jnp.asarray(num_nodes_np),
                       params,
                       graphs_per_step=16)
    out = jax.block_until_ready(out)

    ref = attn_readout_reference(feat, intend,
                                 jnp.asarray(last_nodes_np),
                                 num_nodes_np, params)
    ref = jax.block_until_ready(ref)

    assert out.shape == (B, O)
    np.testing.assert_allclose(np.asarray(out), np.asarray(ref),
                               rtol=1e-3, atol=1e-3)
    print("KERNEL_OK")
</pallas_src>

<mosaic_0001>
module attributes {stable_mosaic.version = 11 : i64} {
  func.func @attn_readout_kernel(%arg0: i32, %arg1: memref<16x8x32xf32, #tpu.memory_space<vmem>>, %arg2: memref<16x1xi32, #tpu.memory_space<vmem>>, %arg3: memref<16x32xf32, #tpu.memory_space<vmem>>, %arg4: memref<32x32xf32, #tpu.memory_space<vmem>>, %arg5: memref<1x32xf32, #tpu.memory_space<vmem>>, %arg6: memref<16x32xf32, #tpu.memory_space<vmem>>) attributes {dimension_semantics = [#tpu.dimension_semantics<parallel>], iteration_bounds = array<i64: 1>, scalar_prefetch = 0 : i64, scratch_operands = 0 : i64, tpu.core_type = #tpu.core_type<tc>, window_params = [{transform_indices = @transform_0, window_bounds = array<i64: 16, 8, 32>}, {transform_indices = @transform_1, window_bounds = array<i64: 16, 1>}, {transform_indices = @transform_2, window_bounds = array<i64: 16, 32>}, {pipeline_mode = #tpu.pipeline_mode<synchronous>, transform_indices = @transform_3, window_bounds = array<i64: 32, 32>}, {pipeline_mode = #tpu.pipeline_mode<synchronous>, transform_indices = @transform_4, window_bounds = array<i64: 1, 32>}, {transform_indices = @transform_5, window_bounds = array<i64: 16, 32>}]} {
    %c0 = arith.constant 0 : index
    %c0_0 = arith.constant 0 : index
    %c0_1 = arith.constant 0 : index
    %0 = vector.load %arg1[%c0, %c0_0, %c0_1] : memref<16x8x32xf32, #tpu.memory_space<vmem>>, vector<16x8x32xf32>
    %1 = vector.shape_cast %0 : vector<16x8x32xf32> to vector<128x32xf32>
    %c0_2 = arith.constant 0 : index
    %c0_3 = arith.constant 0 : index
    %2 = vector.load %arg4[%c0_2, %c0_3] : memref<32x32xf32, #tpu.memory_space<vmem>>, vector<32x32xf32>
    %cst = arith.constant dense<0.000000e+00> : vector<128x32xf32>
    %3 = tpu.matmul %1, %2, %cst {dimension_numbers = #tpu.dot_dimension_numbers<[1], [0], [0], [1], [0, 0, 1, 1], [], []>} : vector<128x32xf32>, vector<32x32xf32>, vector<128x32xf32> -> vector<128x32xf32>
    %4 = vector.shape_cast %3 : vector<128x32xf32> to vector<16x8x32xf32>
    %c0_4 = arith.constant 0 : index
    %c0_5 = arith.constant 0 : index
    %5 = vector.load %arg3[%c0_4, %c0_5] : memref<16x32xf32, #tpu.memory_space<vmem>>, vector<16x32xf32>
    %6 = vector.shape_cast %5 : vector<16x32xf32> to vector<16x1x32xf32>
    %7 = vector.broadcast %6 : vector<16x1x32xf32> to vector<16x8x32xf32>
    %8 = arith.addf %4, %7 : vector<16x8x32xf32>
    %9 = arith.negf %8 : vector<16x8x32xf32>
    %10 = math.exp %9 : vector<16x8x32xf32>
    %cst_6 = arith.constant 1.000000e+00 : f32
    %11 = vector.broadcast %cst_6 : f32 to vector<16x8x32xf32>
    %12 = arith.addf %11, %10 : vector<16x8x32xf32>
    %13 = arith.divf %11, %12 : vector<16x8x32xf32>
    %c0_7 = arith.constant 0 : index
    %c0_8 = arith.constant 0 : index
    %14 = vector.load %arg5[%c0_7, %c0_8] : memref<1x32xf32, #tpu.memory_space<vmem>>, vector<1x32xf32>
    %15 = vector.shape_cast %14 : vector<1x32xf32> to vector<1x1x32xf32>
    %16 = vector.broadcast %15 : vector<1x1x32xf32> to vector<16x8x32xf32>
    %17 = arith.mulf %13, %16 : vector<16x8x32xf32>
    %cst_9 = arith.constant dense<0.000000e+00> : vector<16x8xf32>
    %18 = vector.multi_reduction <add>, %17, %cst_9 [2] : vector<16x8x32xf32> to vector<16x8xf32>
    %19 = tpu.iota {dimensions = array<i32: 1>} : vector<16x8xi32>
    %c0_10 = arith.constant 0 : index
    %c0_11 = arith.constant 0 : index
    %20 = vector.load %arg2[%c0_10, %c0_11] : memref<16x1xi32, #tpu.memory_space<vmem>>, vector<16x1xi32>
    %21 = vector.broadcast %20 : vector<16x1xi32> to vector<16x8xi32>
    %22 = arith.cmpi slt, %19, %21 : vector<16x8xi32>
    %cst_12 = arith.constant -1.000000e+30 : f32
    %23 = vector.broadcast %cst_12 : f32 to vector<16x8xf32>
    %24 = arith.select %22, %18, %23 : vector<16x8xi1>, vector<16x8xf32>
    %cst_13 = arith.constant dense<0xFF800000> : vector<16xf32>
    %25 = vector.multi_reduction <maximumf>, %24, %cst_13 [1] : vector<16x8xf32> to vector<16xf32>
    %26 = vector.shape_cast %25 : vector<16xf32> to vector<16x1xf32>
    %27 = vector.broadcast %26 : vector<16x1xf32> to vector<16x8xf32>
    %28 = arith.subf %24, %27 : vector<16x8xf32>
    %29 = math.exp %28 : vector<16x8xf32>
    %cst_14 = arith.constant 0.000000e+00 : f32
    %30 = vector.broadcast %cst_14 : f32 to vector<16x8xf32>
    %31 = arith.select %22, %29, %30 : vector<16x8xi1>, vector<16x8xf32>
    %cst_15 = arith.constant dense<0.000000e+00> : vector<16xf32>
    %32 = vector.multi_reduction <add>, %31, %cst_15 [1] : vector<16x8xf32> to vector<16xf32>
    %33 = vector.shape_cast %32 : vector<16xf32> to vector<16x1xf32>
    %cst_16 = arith.constant 1.000000e-30 : f32
    %34 = vector.broadcast %cst_16 : f32 to vector<16x1xf32>
    %35 = arith.maximumf %33, %34 : vector<16x1xf32>
    %36 = tpu.reciprocal %35 : vector<16x1xf32> -> vector<16x1xf32>
    %37 = vector.broadcast %36 : vector<16x1xf32> to vector<16x8xf32>
    %38 = arith.mulf %31, %37 : vector<16x8xf32>
    %39 = vector.shape_cast %38 : vector<16x8xf32> to vector<16x8x1xf32>
    %40 = vector.broadcast %39 : vector<16x8x1xf32> to vector<16x8x32xf32>
    %41 = arith.mulf %40, %0 : vector<16x8x32xf32>
    %cst_17 = arith.constant dense<0.000000e+00> : vector<16x32xf32>
    %42 = vector.multi_reduction <add>, %41, %cst_17 [1] : vector<16x8x32xf32> to vector<16x32xf32>
    %c0_18 = arith.constant 0 : index
    %c0_19 = arith.constant 0 : index
    %43 = vector.load %arg6[%c0_18, %c0_19] : memref<16x32xf32, #tpu.memory_space<vmem>>, vector<16x32xf32>
    tpu.vector_store %arg6[%c0_18, %c0_19], %42 {strides = array<i32>} : memref<16x32xf32, #tpu.memory_space<vmem>>, vector<16x32xf32>,
    return
  }
  func.func @transform_0(%arg0: i32) -> (i32, i32, i32) {
    %c0_i32 = arith.constant 0 : i32
    %c0_i32_0 = arith.constant 0 : i32
    %c0_i32_1 = arith.constant 0 : i32
    return %arg0, %c0_i32, %c0_i32_0 : i32, i32, i32
  }
  func.func @transform_1(%arg0: i32) -> (i32, i32) {
    %c0_i32 = arith.constant 0 : i32
    %c0_i32_0 = arith.constant 0 : i32
    return %arg0, %c0_i32 : i32, i32
  }
  func.func @transform_2(%arg0: i32) -> (i32, i32) {
    %c0_i32 = arith.constant 0 : i32
    %c0_i32_0 = arith.constant 0 : i32
    return %arg0, %c0_i32 : i32, i32
  }
  func.func @transform_3(%arg0: i32) -> (i32, i32) {
    %c0_i32 = arith.constant 0 : i32
    %c0_i32_0 = arith.constant 0 : i32
    %c0_i32_1 = arith.constant 0 : i32
    return %c0_i32, %c0_i32_0 : i32, i32
  }
  func.func @transform_4(%arg0: i32) -> (i32, i32) {
    %c0_i32 = arith.constant 0 : i32
    %c0_i32_0 = arith.constant 0 : i32
    %c0_i32_1 = arith.constant 0 : i32
    return %c0_i32, %c0_i32_0 : i32, i32
  }
  func.func @transform_5(%arg0: i32) -> (i32, i32) {
    %c0_i32 = arith.constant 0 : i32
    %c0_i32_0 = arith.constant 0 : i32
    return %arg0, %c0_i32 : i32, i32
  }
}

</mosaic_0001>

<bundles_post_ra>
// kernel: attn_readout.1
= control target key start
LH: loop header
LB: loop body
LE: loop exit
PB: predicated region body
PF: predicated region fallthrough
CT: control target
= control target key end

     0   :  { %vm40_vm0 = vcmask 261120   ;;  %s1843_s3 = inlined_call_operand.vmem [shape: f32[32,32], index: 3, kind: input, shape index: {}]   ;;  %s1844_s0 = inlined_call_operand.vmem [shape: f32[16,8,32], index: 0, kind: input, shape index: {}]   ;;  %s1845_s4 = inlined_call_operand.vmem [shape: f32[1,32], index: 4, kind: input, shape index: {}]   ;;  %s1846_s2 = inlined_call_operand.vmem [shape: f32[16,32], index: 2, kind: input, shape index: {}]   ;;  %s1847_s1 = inlined_call_operand.vmem [shape: s32[16,1], index: 1, kind: input, shape index: {}]   ;;  %s1848_s5 = inlined_call_operand.vmem [shape: f32[16,32], index: 5, kind: output, shape index: {}]  }
   0x1   :  { %v39_v0 = vld [vmem:[%s1843_s3 + $0x18] sm:$0xff]  ;;  %v38_v1 = vld [vmem:[%s1843_s3 + $0x10] sm:$0xff]  ;;  %v37_v2 = vld [vmem:[%s1843_s3 + $0x8] sm:$0xff] }
   0x2   :  { %101 = vmatpush.msra.mxu0 %v39_v0  ;;  %1024 = vmatpush.msra.mxu1 %v39_v0  ;;  %v36_v3 = vld [vmem:[%s1843_s3] sm:$0xff]  ;;  %v25_v8 = vld [vmem:[%s1844_s0 + $0x28] sm:$0xff]  ;;  %v22_v12 = vld [vmem:[%s1844_s0 + $0x10] sm:$0xff] }
   0x3   :  { %1025 = vmatpush.msra.mxu2 %v39_v0  ;;  %1026 = vmatpush.msra.mxu3 %v39_v0  ;;  %v20_v4 = vld [vmem:[%s1844_s0] sm:$0xff]  ;;  %v21_v9 = vld [vmem:[%s1844_s0 + $0x8] sm:$0xff]  ;;  %v26_v13 = vld [vmem:[%s1844_s0 + $0x30] sm:$0xff] }
   0x4   :  { %102 = vmatpush.msra.mxu0 %v38_v1  ;;  %1027 = vmatpush.msra.mxu1 %v38_v1  ;;  %v24_v5 = vld [vmem:[%s1844_s0 + $0x20] sm:$0xff]  ;;  %v29_v10 = vld [vmem:[%s1844_s0 + $0x48] sm:$0xff]  ;;  %v30_v14 = vld [vmem:[%s1844_s0 + $0x50] sm:$0xff] }
   0x5   :  { %1028 = vmatpush.msra.mxu2 %v38_v1  ;;  %1029 = vmatpush.msra.mxu3 %v38_v1  ;;  %v28_v6 = vld [vmem:[%s1844_s0 + $0x40] sm:$0xff]  ;;  %v33_v11 = vld [vmem:[%s1844_s0 + $0x68] sm:$0xff]  ;;  %v34_v15 = vld [vmem:[%s1844_s0 + $0x70] sm:$0xff] }
   0x6   :  { %103 = vmatpush.msra.mxu0 %v37_v2  ;;  %1030 = vmatpush.msra.mxu1 %v37_v2  ;;  %v32_v7 = vld [vmem:[%s1844_s0 + $0x60] sm:$0xff]  ;;  %v23_v16 = vld [vmem:[%s1844_s0 + $0x18] sm:$0xff]  ;;  %v1248_v24 = vld [vmem:[%s1846_s2 + $0x8] sm:$0xff] }
   0x7   :  { %1031 = vmatpush.msra.mxu2 %v37_v2  ;;  %1032 = vmatpush.msra.mxu3 %v37_v2  ;;  %v27_v17 = vld [vmem:[%s1844_s0 + $0x38] sm:$0xff]  ;;  %v1241_v20 = vld [vmem:[%s1846_s2] sm:$0xff]  ;;  %v168_v27 = vrot.slane %v1248_v24, 4  ;;  %v180_v34 = vperm.slane %v1248_v24, 0  ;;  %v165_v40 = vrot.slane %v1248_v24, 1  ;;  %v169_v41 = vrot.slane %v1248_v24, 5 }
   0x8   :  { %104 = vmatpush.msra.mxu0 %v36_v3  ;;  %1033 = vmatpush.msra.mxu1 %v36_v3  ;;  %v31_v18 = vld [vmem:[%s1844_s0 + $0x58] sm:$0xff]  ;;  %v161_v21 = vrot.slane %v1241_v20, 4  ;;  %v172_v22 = vperm.slane %v1241_v20, 0  ;;  %v162_v30 = vrot.slane %v1241_v20, 5  ;;  %v158_v31 = vrot.slane %v1241_v20, 1 }
   0x9   :  { %1034 = vmatpush.msra.mxu2 %v36_v3  ;;  %1035 = vmatpush.msra.mxu3 %v36_v3  ;;  %v35_v19 = vld [vmem:[%s1844_s0 + $0x78] sm:$0xff]  ;;  %v184_v35 = vperm.slane %v168_v27, 0  ;;  %v159_v42 = vrot.slane %v1241_v20, 2  ;;  %v163_v47 = vrot.slane %v1241_v20, 6  ;;  %v166_v52 = vrot.slane %v1248_v24, 2 }
   0xa   :  { %992 = vmatmul.msk.f32.vlgmr.msra.gmra.mxu0 %vm40_vm0, %v20_v4  ;;  %996 = vmatmul.msk.f32.vlgmr.msra.gmra.mxu1 %vm40_vm0, %v24_v5  ;;  %v176_v23 = vperm.slane %v161_v21, 0  ;;  %v177_v36 = vperm.slane %v162_v30, 0  ;;  %v173_v37 = vperm.slane %v158_v31, 0  ;;  %v170_v53 = vrot.slane %v1248_v24, 6 }
   0xb   :  { %1000 = vmatmul.msk.f32.vlgmr.msra.gmra.mxu2 %vm40_vm0, %v28_v6  ;;  %1004 = vmatmul.msk.f32.vlgmr.msra.gmra.mxu3 %vm40_vm0, %v32_v7  ;;  %v181_v55 = vperm.slane %v165_v40, 0  ;;  %v185_v56 = vperm.slane %v169_v41, 0  ;;  %v174_v57 = vperm.slane %v159_v42, 0  ;;  %v167_v58 = vrot.slane %v1248_v24, 3 }
   0xc   :  { %v178_v62 = vperm.slane %v163_v47, 0  ;;  %v160_v1 = vrot.slane %v1241_v20, 3  ;;  %v182_v2 = vperm.slane %v166_v52, 0  ;;  %v186_v3 = vperm.slane %v170_v53, 0 }
   0xd   :  { %v164_v4 = vrot.slane %v1241_v20, 7  ;;  %v1269_v7 = vperm.slane %v167_v58, 0 }
   0xf   :  { %v179_v21 = vperm.slane %v164_v4, 0 }
  0x12   :  { %997 = vmatmul.msk.f32.gmra.mxu1 %vm40_vm0, %v25_v8  ;;  %993 = vmatmul.msk.f32.gmra.mxu0 %vm40_vm0, %v21_v9 }
  0x13   :  { %1001 = vmatmul.msk.f32.gmra.mxu2 %vm40_vm0, %v29_v10  ;;  %1005 = vmatmul.msk.f32.gmra.mxu3 %vm40_vm0, %v33_v11 }
  0x1a   :  { %994 = vmatmul.msk.f32.gmra.mxu0 %vm40_vm0, %v22_v12  ;;  %998 = vmatmul.msk.f32.gmra.mxu1 %vm40_vm0, %v26_v13 }
  0x1b   :  { %1002 = vmatmul.msk.f32.gmra.mxu2 %vm40_vm0, %v30_v14  ;;  %1006 = vmatmul.msk.f32.gmra.mxu3 %vm40_vm0, %v34_v15 }
  0x22   :  { %995 = vmatmul.msk.f32.gmra.mxu0 %vm40_vm0, %v23_v16  ;;  %999 = vmatmul.msk.f32.gmra.mxu1 %vm40_vm0, %v27_v17  ;;  %v175_v17 = vperm.slane %v160_v1, 0 }
  0x23   :  { %1003 = vmatmul.msk.f32.gmra.mxu2 %vm40_vm0, %v31_v18  ;;  %1007 = vmatmul.msk.f32.gmra.mxu3 %vm40_vm0, %v35_v19 }
  0x87   :  { %v106_v25 = vpop.f32.mrf.mxu0  ;;  %v118_v26 = vpop.f32.mrf.mxu1 }
  0x88   :  { %v204_v28 = vadd.f32 %v172_v22, %v106_v25  ;;  %v208_v29 = vadd.f32 %v176_v23, %v118_v26 }
  0x8a   :  { %v1008_v32 = vmul.f32 -1.442695, %v204_v28  ;;  %v1012_v33 = vmul.f32 -1.442695, %v208_v29 }
  0x8c   :  { %1043 = vpow2.f32 %v1008_v32 }
  0x8d   :  { %1045 = vpow2.f32 %v1012_v33 }
  0x8e   :  { %v130_v38 = vpop.f32.mrf.mxu2  ;;  %v142_v39 = vpop.f32.mrf.mxu3 }
  0x8f   :  { %v212_v43 = vadd.f32 %v180_v34, %v130_v38  ;;  %v216_v44 = vadd.f32 %v184_v35, %v142_v39  ;;  %v121_v45 = vpop.f32.mrf.mxu1  ;;  %v109_v46 = vpop.f32.mrf.mxu0  ;;  %v171_v35 = vrot.slane %v1248_v24, 7 }
  0x90   :  { %v209_v48 = vadd.f32 %v177_v36, %v121_v45  ;;  %v205_v49 = vadd.f32 %v173_v37, %v109_v46 }
  0x91   :  { %v1016_v50 = vmul.f32 -1.442695, %v212_v43  ;;  %v1020_v51 = vmul.f32 -1.442695, %v216_v44 }
  0x92   :  { %v1044_v54 = vpop.eup %1043  ;;  %v1013_v61 = vmul.f32 -1.442695, %v209_v48  ;;  %v1009_v0 = vmul.f32 -1.442695, %v205_v49 }
  0x93   :  { %v1046_v59 = vpop.eup %1045  ;;  %v1261_v60 = vadd.f32 1.0, %v1044_v54  ;;  %1047 = vpow2.f32 %v1016_v50 }
  0x94   :  { %v1263_v63 = vadd.f32 1.0, %v1046_v59  ;;  %1049 = vpow2.f32 %v1020_v51 }
  0x95   :  { %1051 = vrcp.f32 %v1261_v60  ;;  %v295_v9 = vand.u32 2147483648, %v1261_v60  ;;  %v293_v14 = vand.u32 2147483647, %v1261_v60  ;;  %vm289_vm1 = vweird.f32 %v1261_v60 }
  0x96   :  { %1053 = vrcp.f32 %v1263_v63  ;;  %v133_v5 = vpop.f32.mrf.mxu2  ;;  %v145_v6 = vpop.f32.mrf.mxu3  ;;  %v355_v8 = vand.u32 2147483648, %v1263_v63  ;;  %v353_v20 = vand.u32 2147483647, %v1263_v63  ;;  %vm349_vm2 = vweird.f32 %v1263_v63 }
  0x97   :  { %1055 = vpow2.f32 %v1013_v61  ;;  %v213_v10 = vadd.f32 %v181_v55, %v133_v5  ;;  %v217_v11 = vadd.f32 %v185_v56, %v145_v6  ;;  %v112_v12 = vpop.f32.mrf.mxu0  ;;  %v124_v13 = vpop.f32.mrf.mxu1  ;;  %v1281_v27 = vor.u32 1.1754944e-38, %v295_v9 }
  0x98   :  { %1057 = vpow2.f32 %v1009_v0  ;;  %v206_v15 = vadd.f32 %v174_v57, %v112_v12  ;;  %v210_v16 = vadd.f32 %v178_v62, %v124_v13  ;;  %v1279_v26 = vor.u32 1.1754944e-38, %v355_v8 }
  0x99   :  { %v1048_v18 = vpop.eup %1047  ;;  %v1017_v19 = vmul.f32 -1.442695, %v213_v10  ;;  %v1021_v25 = vmul.f32 -1.442695, %v217_v11  ;;  %vm1287_vm3 = vcmp.eq.f32.partialorder %v293_v14, 8.507059e+37  ;;  %vm1305_vm6 = vcmp.eq.f32.partialorder %v353_v20, 8.507059e+37 }
  0x9a   :  { %v1050_v22 = vpop.eup %1049  ;;  %v1276_v23 = vadd.f32 1.0, %v1048_v18  ;;  %v1010_v30 = vmul.f32 -1.442695, %v206_v15  ;;  %v1014_v31 = vmul.f32 -1.442695, %v210_v16 }
  0x9b   :  { %v1283_v28 = vpop.eup %1051  ;;  %v1285_v29 = vadd.f32 1.0, %v1050_v22  ;;  %1059 = vpow2.f32 %v1017_v19 }
  0x9c   :  { %v1291_v33 = vpop.eup %1053  ;;  %1061 = vrcp.f32 %v1276_v23  ;;  %v285_v34 = vmul.f32 %v1283_v28, %v1261_v60  ;;  %vm290_vm4 = vweird.f32 %v1283_v28  ;;  %v413_v38 = vand.u32 2147483647, %v1276_v23 }
  0x9d   :  { %v1056_v36 = vpop.eup %1055  ;;  %1063 = vrcp.f32 %v1285_v29  ;;  %v345_v37 = vmul.f32 %v1291_v33, %v1263_v63  ;;  %vm350_vm5 = vweird.f32 %v1291_v33  ;;  %v415_v45 = vand.u32 2147483648, %v1276_v23  ;;  %vm1324_vm7 = vmor %vm289_vm1, %vm290_vm4 }
  0x9e   :  { %v1058_v39 = vpop.eup %1057  ;;  %v1303_v40 = vadd.f32 1.0, %v1056_v36  ;;  %1065 = vpow2.f32 %v1021_v25  ;;  %v136_v41 = vpop.f32.mrf.mxu2  ;;  %v286_v44 = vsub.f32 1.0, %v285_v34  ;;  %vm409_vm8 = vweird.f32 %v1276_v23  ;;  %vm351_vm11 = vmor %vm349_vm2, %vm350_vm5 }
  0x9f   :  { %v148_v42 = vpop.f32.mrf.mxu3  ;;  %v1310_v46 = vadd.f32 1.0, %v1058_v39  ;;  %1067 = vpow2.f32 %v1010_v30  ;;  %v214_v47 = vadd.f32 %v182_v2, %v136_v41  ;;  %v115_v49 = vpop.f32.mrf.mxu0  ;;  %v346_v52 = vsub.f32 1.0, %v345_v37  ;;  %v1334_v2 = vld [vmem:[%s1845_s4] ss:$0 sm:$0xff] }
  0xa0   :  { %v218_v48 = vadd.f32 %v186_v3, %v148_v42  ;;  %v127_v50 = vpop.f32.mrf.mxu1  ;;  %1069 = vrcp.f32 %v1303_v40  ;;  %v207_v51 = vadd.f32 %v175_v17, %v115_v49  ;;  %v287_v53 = vmul.f32 %v1283_v28, %v286_v44 }
  0xa1   :  { %v1060_v54 = vpop.eup %1059  ;;  %1071 = vrcp.f32 %v1310_v46  ;;  %v1018_v55 = vmul.f32 -1.442695, %v214_v47  ;;  %v211_v57 = vadd.f32 %v179_v21, %v127_v50  ;;  %v347_v62 = vmul.f32 %v1291_v33, %v346_v52 }
  0xa2   :  { %v1022_v56 = vmul.f32 -1.442695, %v218_v48  ;;  %v1315_v58 = vpop.eup %1061  ;;  %v1317_v59 = vadd.f32 1.0, %v1060_v54  ;;  %1073 = vpow2.f32 %v1014_v31  ;;  %v1011_v61 = vmul.f32 -1.442695, %v207_v51 }
  0xa3   :  { %v1329_v1 = vpop.eup %1063  ;;  %1075 = vpow2.f32 %v1018_v55  ;;  %v288_v3 = vadd.f32 %v1283_v28, %v287_v53  ;;  %v1015_v4 = vmul.f32 -1.442695, %v211_v57  ;;  %v405_v60 = vmul.f32 %v1315_v58, %v1276_v23 }
  0xa4   :  { %v1066_v5 = vpop.eup %1065  ;;  %1077 = vrcp.f32 %v1317_v59  ;;  %v348_v6 = vadd.f32 %v1291_v33, %v347_v62  ;;  %vm410_vm9 = vweird.f32 %v1315_v58  ;;  %vm1342_vm10 = vcmp.eq.f32.partialorder %v413_v38, 8.507059e+37 }
  0xa5   :  { %v1068_v9 = vpop.eup %1067  ;;  %v1346_v10 = vadd.f32 1.0, %v1066_v5  ;;  %1079 = vpow2.f32 %v1022_v56  ;;  %v292_v11 = vsel %vm1324_vm7, %v1283_v28, %v288_v3  ;;  %v406_v12 = vsub.f32 1.0, %v405_v60  ;;  %vm411_vm12 = vmor %vm409_vm8, %vm410_vm9 }
  0xa6   :  { %v1355_v13 = vpop.eup %1069  ;;  %v1357_v14 = vadd.f32 1.0, %v1068_v9  ;;  %v139_v15 = vpop.f32.mrf.mxu2  ;;  %1081 = vpow2.f32 %v1011_v61  ;;  %v352_v16 = vsel %vm351_vm11, %v1291_v33, %v348_v6  ;;  %v297_v17 = vsel %vm1287_vm3, %v1281_v27, %v292_v11 }
  0xa7   :  { %v1363_v18 = vpop.eup %1071  ;;  %1083 = vrcp.f32 %v1346_v10  ;;  %v215_v63 = vadd.f32 %v1269_v7, %v139_v15  ;;  %v357_v19 = vsel %vm1305_vm6, %v1279_v26, %v352_v16  ;;  %v528_v20 = vmul.f32 %v1334_v2, %v297_v17  ;;  %v151_v32 = vpop.f32.mrf.mxu3 }
  0xa8   :  { %v1074_v21 = vpop.eup %1073  ;;  %1085 = vrcp.f32 %v1357_v14  ;;  %v532_v22 = vmul.f32 %v1334_v2, %v357_v19  ;;  %v407_v25 = vmul.f32 %v1315_v58, %v406_v12  ;;  %v416_v27 = vor.u32 1.1754944e-38, %v415_v45 }
  0xa9   :  { %v1076_v28 = vpop.eup %1075  ;;  %v1374_v30 = vadd.f32 1.0, %v1074_v21  ;;  %v1019_v31 = vmul.f32 -1.442695, %v215_v63  ;;  %v544_v7 = vsel %vm40_vm0, %v528_v20, 0.0  ;;  %1087 = vpow2.f32 %v1015_v4 }
  0xaa   :  { %v1377_v33 = vpop.eup %1077  ;;  %v1379_v26 = vadd.f32 1.0, %v1076_v28  ;;  %v556_v34 = vsel %vm40_vm0, %v532_v22, 0.0  ;;  %545 = vadd.xlane.f32.xlu0 %v544_v7  ;;  %v408_v36 = vadd.f32 %v1315_v58, %v407_v25  ;;  %v187_v37 = vperm.slane %v171_v35, 0 }
  0xab   :  { %v1080_v38 = vpop.eup %1079  ;;  %1089 = vrcp.f32 %v1374_v30  ;;  %557 = vadd.xlane.f32.xlu2 %v556_v34  ;;  %v465_v39 = vmul.f32 %v1329_v1, %v1285_v29  ;;  %vm469_vm13 = vweird.f32 %v1285_v29  ;;  %vm470_vm14 = vweird.f32 %v1329_v1 }
  0xac   :  { %v1082_v41 = vpop.eup %1081  ;;  %1091 = vrcp.f32 %v1379_v26  ;;  %v1395_v24 = vadd.f32 1.0, %v1080_v38  ;;  %v412_v35 = vsel %vm411_vm12, %v1315_v58, %v408_v36  ;;  %v219_v42 = vadd.f32 %v187_v37, %v151_v32  ;;  %vm471_vm2 = vmor %vm469_vm13, %vm470_vm14 }
  0xad   :  { %v1084_v43 = vpop.eup %1083  ;;  %1093 = vpow2.f32 %v1019_v31  ;;  %v1398_v44 = vadd.f32 1.0, %v1082_v41  ;;  %v417_v23 = vsel %vm1342_vm10, %v416_v27, %v412_v35  ;;  %v466_v45 = vsub.f32 1.0, %v465_v39 }
  0xae   :  { %v1402_v47 = vpop.eup %1085  ;;  %1095 = vrcp.f32 %v1395_v24  ;;  %v536_v48 = vmul.f32 %v1334_v2, %v417_v23  ;;  %v1023_v49 = vmul.f32 -1.442695, %v219_v42  ;;  %v473_v50 = vand.u32 2147483647, %v1285_v29 }
  0xaf   :  { %v1088_v51 = vpop.eup %1087  ;;  %1097 = vrcp.f32 %v1398_v44  ;;  %v467_v52 = vmul.f32 %v1329_v1, %v466_v45  ;;  %v475_v53 = vand.u32 2147483648, %v1285_v29  ;;  %v480_v54 = vmul.f32 %v1084_v43, %v1346_v10 }
  0xb0   :  { %v1411_v55 = vadd.f32 1.0, %v1088_v51  ;;  %v568_v56 = vsel %vm40_vm0, %v536_v48, 0.0  ;;  %1099 = vpow2.f32 %v1023_v49  ;;  %vm1414_vm15 = vcmp.eq.f32.partialorder %v473_v50, 8.507059e+37 }
  0xb1   :  { %v1418_v58 = vpop.eup %1089  ;;  %569 = vadd.xlane.f32.xlu1 %v568_v56  ;;  %v468_v61 = vadd.f32 %v1329_v1, %v467_v52  ;;  %v476_v62 = vor.u32 1.1754944e-38, %v475_v53  ;;  %v481_v0 = vsub.f32 1.0, %v480_v54  ;;  %vm484_vm1 = vweird.f32 %v1346_v10 }
  0xb2   :  { %v1422_v3 = vpop.eup %1091  ;;  %1101 = vrcp.f32 %v1411_v55  ;;  %vm485_vm3 = vweird.f32 %v1084_v43  ;;  %v488_v4 = vand.u32 2147483647, %v1346_v10  ;;  %v490_v60 = vand.u32 2147483648, %v1346_v10 }
  0xb3   :  { %v1094_v5 = vpop.eup %1093  ;;  %v472_v6 = vsel %vm471_vm2, %v1329_v1, %v468_v61  ;;  %v482_v8 = vmul.f32 %v1084_v43, %v481_v0  ;;  %v360_v9 = vmul.f32 %v1355_v13, %v1303_v40  ;;  %vm364_vm4 = vweird.f32 %v1303_v40  ;;  %vm486_vm7 = vmor %vm484_vm1, %vm485_vm3 }
  0xb4   :  { %v1435_v11 = vpop.eup %1095  ;;  %v1437_v12 = vadd.f32 1.0, %v1094_v5  ;;  %v477_v29 = vsel %vm1414_vm15, %v476_v62, %v472_v6  ;;  %vm1441_vm5 = vcmp.eq.f32.partialorder %v488_v4, 8.507059e+37  ;;  %v491_v16 = vor.u32 1.1754944e-38, %v490_v60 }
  0xb5   :  { %v1445_v17 = vpop.eup %1097  ;;  %v540_v1 = vmul.f32 %v1334_v2, %v477_v29  ;;  %v483_v63 = vadd.f32 %v1084_v43, %v482_v8  ;;  %v361_v19 = vsub.f32 1.0, %v360_v9  ;;  %vm365_vm6 = vweird.f32 %v1355_v13 }
  0xb6   :  { %v1100_v20 = vpop.eup %1099  ;;  %1103 = vrcp.f32 %v1437_v12  ;;  %v368_v21 = vand.u32 2147483647, %v1303_v40  ;;  %v370_v22 = vand.u32 2147483648, %v1303_v40  ;;  %v300_v25 = vmul.f32 %v1363_v18, %v1310_v46  ;;  %vm366_vm10 = vmor %vm364_vm4, %vm365_vm6 }
  0xb7   :  { %v1457_v27 = vadd.f32 1.0, %v1100_v20  ;;  %v580_v28 = vsel %vm40_vm0, %v540_v1, 0.0  ;;  %v487_v31 = vsel %vm486_vm7, %v1084_v43, %v483_v63  ;;  %v362_v7 = vmul.f32 %v1355_v13, %v361_v19 }
  0xb8   :  { %v1461_v32 = vpop.eup %1101  ;;  %581 = vadd.xlane.f32.xlu0 %v580_v28  ;;  %v492_v10 = vsel %vm1441_vm5, %v491_v16, %v487_v31  ;;  %vm1465_vm8 = vcmp.eq.f32.partialorder %v368_v21, 8.507059e+37  ;;  %v371_v36 = vor.u32 1.1754944e-38, %v370_v22  ;;  %v301_v37 = vsub.f32 1.0, %v300_v25 }
  0xb9   :  { %1105 = vrcp.f32 %v1457_v27  ;;  %v541_v38 = vmul.f32 %v1334_v2, %v492_v10  ;;  %v363_v39 = vadd.f32 %v1355_v13, %v362_v7  ;;  %vm304_vm9 = vweird.f32 %v1310_v46 }
  0xba   :  { %v302_v41 = vmul.f32 %v1363_v18, %v301_v37  ;;  %vm305_vm11 = vweird.f32 %v1363_v18  ;;  %v308_v35 = vand.u32 2147483647, %v1310_v46  ;;  %v310_v42 = vand.u32 2147483648, %v1310_v46 }
  0xbb   :  { %v583_v43 = vsel %vm40_vm0, %v541_v38, 0.0  ;;  %v367_v23 = vsel %vm366_vm10, %v1355_v13, %v363_v39  ;;  %vm1483_vm12 = vmor %vm304_vm9, %vm305_vm11  ;;  %v420_v40 = vmul.f32 %v1377_v33, %v1317_v59  ;;  %vm424_vm13 = vweird.f32 %v1317_v59 }
  0xbc   :  { %v1490_v48 = vpop.eup %1103  ;;  %584 = vadd.xlane.f32.xlu2 %v583_v43  ;;  %v372_v49 = vsel %vm1465_vm8, %v371_v36, %v367_v23  ;;  %v303_v46 = vadd.f32 %v1363_v18, %v302_v41  ;;  %vm309_vm14 = vcmp.eq.f32.partialorder %v308_v35, 8.507059e+37  ;;  %v311_v50 = vor.u32 1.1754944e-38, %v310_v42 }
  0xbd   :  { %v533_v13 = vmul.f32 %v1334_v2, %v372_v49  ;;  %v421_v51 = vsub.f32 1.0, %v420_v40  ;;  %vm425_vm15 = vweird.f32 %v1377_v33  ;;  %v428_v52 = vand.u32 2147483647, %v1317_v59 }
  0xbe   :  { %v307_v53 = vsel %vm1483_vm12, %v1363_v18, %v303_v46  ;;  %v430_v54 = vand.u32 2147483648, %v1317_v59  ;;  %v315_v56 = vmul.f32 %v1402_v47, %v1357_v14  ;;  %vm319_vm1 = vweird.f32 %v1357_v14  ;;  %vm426_vm4 = vmor %vm424_vm13, %vm425_vm15 }
  0xbf   :  { %v1505_v57 = vpop.eup %1105  ;;  %v559_v61 = vsel %vm40_vm0, %v533_v13, 0.0  ;;  %v312_v62 = vsel %vm309_vm14, %v311_v50, %v307_v53  ;;  %v422_v0 = vmul.f32 %v1377_v33, %v421_v51  ;;  %vm1509_vm2 = vcmp.eq.f32.partialorder %v428_v52, 8.507059e+37 }
  0xc0   :  { %560 = vadd.xlane.f32.xlu1 %v559_v61  ;;  %v529_v18 = vmul.f32 %v1334_v2, %v312_v62  ;;  %v431_v60 = vor.u32 1.1754944e-38, %v430_v54  ;;  %v316_v5 = vsub.f32 1.0, %v315_v56  ;;  %vm320_vm3 = vweird.f32 %v1402_v47 }
  0xc1   :  { %v423_v6 = vadd.f32 %v1377_v33, %v422_v0  ;;  %v323_v8 = vand.u32 2147483647, %v1357_v14  ;;  %v325_v9 = vand.u32 2147483648, %v1357_v14  ;;  %v375_v29 = vmul.f32 %v1418_v58, %v1374_v30  ;;  %vm1531_vm7 = vmor %vm319_vm1, %vm320_vm3 }
  0xc2   :  { %v547_v15 = vsel %vm40_vm0, %v529_v18, 0.0  ;;  %v317_v16 = vmul.f32 %v1402_v47, %v316_v5  ;;  %vm379_vm5 = vweird.f32 %v1374_v30  ;;  %vm380_vm6 = vweird.f32 %v1418_v58 }
  0xc3   :  { %548 = vadd.xlane.f32.xlu0 %v547_v15  ;;  %v427_v1 = vsel %vm426_vm4, %v1377_v33, %v423_v6  ;;  %vm1535_vm8 = vcmp.eq.f32.partialorder %v323_v8, 8.507059e+37  ;;  %v326_v59 = vor.u32 1.1754944e-38, %v325_v9  ;;  %v376_v20 = vsub.f32 1.0, %v375_v29  ;;  %vm1556_vm10 = vmor %vm379_vm5, %vm380_vm6 }
  0xc4   :  { %v432_v21 = vsel %vm1509_vm2, %v431_v60, %v427_v1  ;;  %v318_v22 = vadd.f32 %v1402_v47, %v317_v16  ;;  %v383_v25 = vand.u32 2147483647, %v1374_v30  ;;  %v385_v33 = vand.u32 2147483648, %v1374_v30 }
  0xc5   :  { %v537_v14 = vmul.f32 %v1334_v2, %v432_v21  ;;  %v377_v28 = vmul.f32 %v1418_v58, %v376_v20  ;;  %v495_v31 = vmul.f32 %v1435_v11, %v1395_v24  ;;  %vm499_vm9 = vweird.f32 %v1395_v24 }
  0xc6   :  { %v322_v7 = vsel %vm1531_vm7, %v1402_v47, %v318_v22  ;;  %vm1560_vm11 = vcmp.eq.f32.partialorder %v383_v25, 8.507059e+37  ;;  %v386_v36 = vor.u32 1.1754944e-38, %v385_v33  ;;  %vm500_vm12 = vweird.f32 %v1435_v11 }
  0xc7   :  { %v571_v37 = vsel %vm40_vm0, %v537_v14, 0.0  ;;  %v327_v47 = vsel %vm1535_vm8, %v326_v59, %v322_v7  ;;  %v378_v38 = vadd.f32 %v1418_v58, %v377_v28  ;;  %v496_v39 = vsub.f32 1.0, %v495_v31  ;;  %vm501_vm1 = vmor %vm499_vm9, %vm500_vm12 }
  0xc8   :  { %572 = vadd.xlane.f32.xlu1 %v571_v37  ;;  %v530_v30 = vmul.f32 %v1334_v2, %v327_v47  ;;  %v503_v41 = vand.u32 2147483647, %v1395_v24  ;;  %v505_v35 = vand.u32 2147483648, %v1395_v24  ;;  %v435_v42 = vmul.f32 %v1422_v3, %v1379_v26 }
  0xc9   :  { %v382_v43 = vsel %vm1556_vm10, %v1418_v58, %v378_v38  ;;  %v497_v23 = vmul.f32 %v1435_v11, %v496_v39  ;;  %vm439_vm13 = vweird.f32 %v1379_v26  ;;  %vm440_vm14 = vweird.f32 %v1422_v3 }
  0xca   :  { %v550_v45 = vsel %vm40_vm0, %v530_v30, 0.0  ;;  %v387_v40 = vsel %vm1560_vm11, %v386_v36, %v382_v43  ;;  %vm1583_vm15 = vcmp.eq.f32.partialorder %v503_v41, 8.507059e+37  ;;  %v506_v46 = vor.u32 1.1754944e-38, %v505_v35  ;;  %vm441_vm5 = vmor %vm439_vm13, %vm440_vm14 }
  0xcb   :  { %551 = vadd.xlane.f32.xlu2 %v550_v45  ;;  %v534_v50 = vmul.f32 %v1334_v2, %v387_v40  ;;  %v498_v58 = vadd.f32 %v1435_v11, %v497_v23  ;;  %v436_v13 = vsub.f32 1.0, %v435_v42  ;;  %v443_v51 = vand.u32 2147483647, %v1379_v26 }
  0xcc   :  { %v445_v52 = vand.u32 2147483648, %v1379_v26  ;;  %v330_v53 = vmul.f32 %v1445_v17, %v1398_v44  ;;  %vm334_vm2 = vweird.f32 %v1398_v44  ;;  %vm335_vm3 = vweird.f32 %v1445_v17 }
  0xcd   :  { %v562_v54 = vsel %vm40_vm0, %v534_v50, 0.0  ;;  %v502_v56 = vsel %vm501_vm1, %v1435_v11, %v498_v58  ;;  %v437_v61 = vmul.f32 %v1422_v3, %v436_v13  ;;  %vm1602_vm4 = vcmp.eq.f32.partialorder %v443_v51, 8.507059e+37  ;;  %vm1631_vm9 = vmor %vm334_vm2, %vm335_vm3 }
  0xce   :  { %563 = vadd.xlane.f32.xlu0 %v562_v54  ;;  %v507_v24 = vsel %vm1583_vm15, %v506_v46, %v502_v56  ;;  %v446_v0 = vor.u32 1.1754944e-38, %v445_v52  ;;  %v331_v4 = vsub.f32 1.0, %v330_v53  ;;  %v338_v18 = vand.u32 2147483647, %v1398_v44  ;;  %v595_v54 = vld [vmem:[%s1847_s1 + $0x8] sm:$0xff] }
  0xcf   :  { %v542_v60 = vmul.f32 %v1334_v2, %v507_v24  ;;  %v438_v5 = vadd.f32 %v1422_v3, %v437_v61  ;;  %v340_v11 = vand.u32 2147483648, %v1398_v44  ;;  %v450_v6 = vmul.f32 %v1490_v48, %v1437_v12 }
  0xd0   :  { %v332_v8 = vmul.f32 %v1445_v17, %v331_v4  ;;  %vm1619_vm6 = vcmp.eq.f32.partialorder %v338_v18, 8.507059e+37  ;;  %vm454_vm7 = vweird.f32 %v1437_v12  ;;  %vm455_vm8 = vweird.f32 %v1490_v48 }
  0xd1   :  { %v586_v29 = vsel %vm40_vm0, %v542_v60, 0.0  ;;  %v442_v15 = vsel %vm441_vm5, %v1422_v3, %v438_v5  ;;  %v341_v16 = vor.u32 1.1754944e-38, %v340_v11  ;;  %v451_v1 = vsub.f32 1.0, %v450_v6  ;;  %vm456_vm13 = vmor %vm454_vm7, %vm455_vm8 }
  0xd2   :  { %587 = vadd.xlane.f32.xlu1 %v586_v29  ;;  %v447_v63 = vsel %vm1602_vm4, %v446_v0, %v442_v15  ;;  %v333_v19 = vadd.f32 %v1445_v17, %v332_v8  ;;  %v458_v59 = vand.u32 2147483647, %v1437_v12  ;;  %v460_v3 = vand.u32 2147483648, %v1437_v12 }
  0xd3   :  { %v538_v20 = vmul.f32 %v1334_v2, %v447_v63  ;;  %v452_v44 = vmul.f32 %v1490_v48, %v451_v1  ;;  %v390_v21 = vmul.f32 %v1461_v32, %v1411_v55  ;;  %vm394_vm10 = vweird.f32 %v1411_v55 }
  0xd4   :  { %v337_v22 = vsel %vm1631_vm9, %v1445_v17, %v333_v19  ;;  %vm1648_vm11 = vcmp.eq.f32.partialorder %v458_v59, 8.507059e+37  ;;  %v461_v33 = vor.u32 1.1754944e-38, %v460_v3  ;;  %vm395_vm12 = vweird.f32 %v1461_v32 }
  0xd5   :  { %v574_v14 = vsel %vm40_vm0, %v538_v20, 0.0  ;;  %v342_v28 = vsel %vm1619_vm6, %v341_v16, %v337_v22  ;;  %v453_v31 = vadd.f32 %v1490_v48, %v452_v44  ;;  %v391_v7 = vsub.f32 1.0, %v390_v21  ;;  %vm1677_vm1 = vmor %vm394_vm10, %vm395_vm12 }
  0xd6   :  { %575 = vadd.xlane.f32.xlu2 %v574_v14  ;;  %v531_v10 = vmul.f32 %v1334_v2, %v342_v28  ;;  %v398_v17 = vand.u32 2147483647, %v1411_v55  ;;  %v400_v34 = vand.u32 2147483648, %v1411_v55  ;;  %v510_v36 = vmul.f32 %v1505_v57, %v1457_v27 }
  0xd7   :  { %v457_v37 = vsel %vm456_vm13, %v1490_v48, %v453_v31  ;;  %v392_v47 = vmul.f32 %v1461_v32, %v391_v7  ;;  %vm514_vm14 = vweird.f32 %v1457_v27  ;;  %vm515_vm15 = vweird.f32 %v1505_v57 }
  0xd8   :  { %v553_v38 = vsel %vm40_vm0, %v531_v10, 0.0  ;;  %v462_v12 = vsel %vm1648_vm11, %v461_v33, %v457_v37  ;;  %vm399_vm2 = vcmp.eq.f32.partialorder %v398_v17, 8.507059e+37  ;;  %v401_v48 = vor.u32 1.1754944e-38, %v400_v34  ;;  %vm516_vm3 = vmor %vm514_vm14, %vm515_vm15 }
  0xd9   :  { %554 = vadd.xlane.f32.xlu0 %v553_v38  ;;  %v539_v30 = vmul.f32 %v1334_v2, %v462_v12  ;;  %v393_v41 = vadd.f32 %v1461_v32, %v392_v47  ;;  %v511_v35 = vsub.f32 1.0, %v510_v36  ;;  %v518_v42 = vand.u32 2147483647, %v1457_v27 }
  0xda   :  { %v520_v43 = vand.u32 2147483648, %v1457_v27  ;;  %v1131_v40 = vmov 0   ;;  %v594_v27 = vld [vmem:[%s1847_s1] sm:$0xff]  ;;  %v592_v11 = vlaneseq  ;;  %vm636_vm5 = vcmask 1041409  }
  0xdb   :  { %v577_v23 = vsel %vm40_vm0, %v539_v30, 0.0  ;;  %v397_v55 = vsel %vm1677_vm1, %v1461_v32, %v393_v41  ;;  %v512_v45 = vmul.f32 %v1505_v57, %v511_v35  ;;  %1037 = vset.pattern.permute.xlu1 %v1131_v40  ;;  %1038 = vset.pattern.permute.xlu2 %v1131_v40  ;;  %vm519_vm4 = vcmp.eq.f32.partialorder %v518_v42, 8.507059e+37 }
  0xdc   :  { %578 = vadd.xlane.f32.xlu1 %v577_v23  ;;  %v402_v49 = vsel %vm399_vm2, %v401_v48, %v397_v55  ;;  %v521_v46 = vor.u32 1.1754944e-38, %v520_v43  ;;  %v1707_v8 = vand.u32 127, %v592_v11  ;;  %vm638_vm6 = vcmask 1042434  }
  0xdd   :  { %v535_v50 = vmul.f32 %v1334_v2, %v402_v49  ;;  %v513_v58 = vadd.f32 %v1505_v57, %v512_v45  ;;  %vm640_vm7 = vcmask 1043459   ;;  %vm642_vm8 = vcmask 1044484  }
  0xde   :  { %vm644_vm9 = vcmask 1045509   ;;  %vm646_vm10 = vcmask 1046534   ;;  %vm648_vm11 = vcmask 1047559   ;;  %vm661_vm13 = vcmask 64512  }
  0xdf   :  { %v565_v32 = vsel %vm40_vm0, %v535_v50, 0.0  ;;  %v517_v13 = vsel %vm516_vm3, %v1505_v57, %v513_v58 }
  0xe0   :  { %566 = vadd.xlane.f32.xlu2 %v565_v32  ;;  %v522_v51 = vsel %vm519_vm4, %v521_v46, %v517_v13 }
  0xe1   :  { %v543_v52 = vmul.f32 %v1334_v2, %v522_v51 }
  0xe3   :  { %v589_v53 = vsel %vm40_vm0, %v543_v52, 0.0 }
  0xe4   :  { %590 = vadd.xlane.f32.xlu0 %v589_v53 }
  0xf5   :  { %597 = vperm.xlu1 %1037, %v594_v27  }
  0xf8   :  { %600 = vperm.xlu2 %1038, %v595_v54  }
 0x11d   :  { %v546_v56 = vpop.xlane.xlu0 %545 }
 0x11e   :  { %v558_v57 = vpop.xlane.xlu2 %557  ;;  %v620_v26 = vperm.slane %v546_v56, %v1707_v8 }
 0x11f   :  { %v624_v22 = vperm.slane %v558_v57, %v1707_v8  ;;  %v716_v57 = vshrl.u32 %v592_v11, 7 }
 0x121   :  { %1040 = vset.pattern.permute.xlu0 %v716_v57  ;;  %1039 = vset.pattern.permute.xlu1 %v716_v57 }
 0x122   :  { %1041 = vset.pattern.permute.xlu2 %v716_v57  ;;  %v1119_v57 = vld [vmem:[%s1844_s0 + $0x30] sm:$0xff] }
 0x124   :  { %v570_v61 = vpop.xlane.xlu1 %569 }
 0x125   :  { %v628_v20 = vperm.slane %v570_v61, %v1707_v8 }
 0x12b   :  { %v582_v62 = vpop.xlane.xlu0 %581 }
 0x12c   :  { %v632_v10 = vperm.slane %v582_v62, %v1707_v8 }
 0x12f   :  { %v585_v0 = vpop.xlane.xlu2 %584 }
 0x130   :  { %v633_v47 = vperm.slane %v585_v0, %v1707_v8 }
 0x133   :  { %v561_v24 = vpop.xlane.xlu1 %560 }
 0x134   :  { %v625_v31 = vperm.slane %v561_v24, %v1707_v8 }
 0x136   :  { %v549_v2 = vpop.xlane.xlu0 %548 }
 0x137   :  { %v621_v29 = vperm.slane %v549_v2, %v1707_v8 }
 0x139   :  { %v637_v63 = vsel %vm636_vm5, %v621_v29, %v620_v26 }
 0x13b   :  { %v573_v4 = vpop.xlane.xlu1 %572 }
 0x13c   :  { %v629_v19 = vperm.slane %v573_v4, %v1707_v8 }
 0x13e   :  { %v552_v18 = vpop.xlane.xlu2 %551  ;;  %v650_v33 = vsel %vm636_vm5, %v629_v19, %v628_v20 }
 0x13f   :  { %v622_v15 = vperm.slane %v552_v18, %v1707_v8 }
 0x141   :  { %v564_v60 = vpop.xlane.xlu0 %563  ;;  %v639_v59 = vsel %vm638_vm6, %v622_v15, %v637_v63 }
 0x142   :  { %v626_v17 = vperm.slane %v564_v60, %v1707_v8 }
 0x145   :  { %v588_v5 = vpop.xlane.xlu1 %587 }
 0x146   :  { %v634_v41 = vperm.slane %v588_v5, %v1707_v8 }
 0x149   :  { %v576_v6 = vpop.xlane.xlu2 %575 }
 0x14a   :  { %v630_v3 = vperm.slane %v576_v6, %v1707_v8 }
 0x14c   :  { %v555_v9 = vpop.xlane.xlu0 %554  ;;  %v651_v14 = vsel %vm638_vm6, %v630_v3, %v650_v33 }
 0x14d   :  { %v623_v16 = vperm.slane %v555_v9, %v1707_v8 }
 0x14f   :  { %v579_v1 = vpop.xlane.xlu1 %578  ;;  %v641_v44 = vsel %vm640_vm7, %v623_v16, %v639_v59 }
 0x150   :  { %v631_v21 = vperm.slane %v579_v1, %v1707_v8  ;;  %v643_v28 = vsel %vm642_vm8, %v624_v22, %v641_v44 }
 0x151   :  { %v645_v36 = vsel %vm644_vm9, %v625_v31, %v643_v28 }
 0x152   :  { %v652_v7 = vsel %vm640_vm7, %v631_v21, %v651_v14  ;;  %v647_v39 = vsel %vm646_vm10, %v626_v17, %v645_v36 }
 0x153   :  { %v567_v25 = vpop.xlane.xlu2 %566  ;;  %v653_v37 = vsel %vm642_vm8, %v632_v10, %v652_v7 }
 0x154   :  { %v627_v34 = vperm.slane %v567_v25, %v1707_v8  ;;  %v654_v30 = vsel %vm644_vm9, %v633_v47, %v653_v37 }
 0x155   :  { %v655_v55 = vsel %vm646_vm10, %v634_v41, %v654_v30 }
 0x156   :  { %v649_v48 = vsel %vm648_vm11, %v627_v34, %v647_v39 }
 0x157   :  { %v591_v38 = vpop.xlane.xlu0 %590 }
 0x158   :  { %v635_v43 = vperm.slane %v591_v38, %v1707_v8 }
 0x15a   :  { %v656_v45 = vsel %vm648_vm11, %v635_v43, %v655_v55 }
 0x15b   :  { %v601_v35 = vpop.permute.xlu2 %600 }
 0x15c   :  { %vm603_vm14 = vcmp.lt.s32.totalorder %v1707_v8, %v601_v35 }
 0x15d   :  { %v660_v40 = vsel %vm603_vm14, %v656_v45, -1e+30  ;;  %v1116_v45 = vld [vmem:[%s1844_s0] sm:$0xff] }
 0x15e   :  { %v665_v49 = vsel %vm661_vm13, %v660_v40, -inf }
 0x167   :  { %v598_v12 = vpop.permute.xlu1 %597 }
 0x168   :  { %vm602_vm12 = vcmp.lt.s32.totalorder %v1707_v8, %v598_v12 }
 0x169   :  { %v659_v42 = vsel %vm602_vm12, %v649_v48, -1e+30 }
 0x16a   :  { %v662_v23 = vsel %vm661_vm13, %v659_v42, -inf }
 0x16b   :  { %663 = vmax.xlane.f32.xlu0 %v662_v23  ;;  %v1115_v23 = vld [vmem:[%s1844_s0 + $0x8] sm:$0xff] }
 0x173   :  { %666 = vmax.xlane.f32.xlu0 %v665_v49  ;;  %v1117_v49 = vld [vmem:[%s1844_s0 + $0x10] sm:$0xff] }
 0x1de   :  { %v664_v46 = vpop.xlane.xlu0 %663 }
 0x1df   :  { %v668_v50 = vsub.f32 %v659_v42, %v664_v46 }
 0x1e1   :  { %v670_v58 = vmul.f32 1.442695, %v668_v50 }
 0x1e3   :  { %1107 = vpow2.f32 %v670_v58 }
 0x1e6   :  { %v667_v32 = vpop.xlane.xlu0 %666 }
 0x1e7   :  { %v669_v13 = vsub.f32 %v660_v40, %v667_v32 }
 0x1e9   :  { %v1108_v51 = vpop.eup %1107  ;;  %v672_v52 = vmul.f32 1.442695, %v669_v13 }
 0x1ea   :  { %v674_v53 = vsel %vm602_vm12, %v1108_v51, 0.0  ;;  %v1118_v51 = vld [vmem:[%s1844_s0 + $0x18] sm:$0xff] }
 0x1eb   :  { %1109 = vpow2.f32 %v672_v52  ;;  %v676_v27 = vsel %vm661_vm13, %v674_v53, 0.0 }
 0x1ec   :  { %677 = vadd.xlane.f32.xlu0 %v676_v27 }
 0x1f1   :  { %v1110_v54 = vpop.eup %1109 }
 0x1f2   :  { %v675_v56 = vsel %vm603_vm14, %v1110_v54, 0.0 }
 0x1f3   :  { %v679_v61 = vsel %vm661_vm13, %v675_v56, 0.0 }
 0x1f4   :  { %680 = vadd.xlane.f32.xlu2 %v679_v61 }
 0x25f   :  { %v678_v62 = vpop.xlane.xlu0 %677 }
 0x260   :  { %v682_v24 = vmax.f32 %v678_v62, 1e-30 }
 0x262   :  { %1111 = vrcp.f32 %v682_v24  ;;  %v695_v5 = vand.u32 2147483648, %v682_v24  ;;  %v693_v8 = vand.u32 2147483647, %v682_v24  ;;  %vm689_vm1 = vweird.f32 %v682_v24 }
 0x264   :  { %v696_v11 = vor.u32 1.1754944e-38, %v695_v5  ;;  %vm694_vm3 = vcmp.eq.f32.partialorder %v693_v8, 8.507059e+37 }
 0x267   :  { %v681_v0 = vpop.xlane.xlu2 %680 }
 0x268   :  { %v1112_v2 = vpop.eup %1111  ;;  %v683_v4 = vmax.f32 %v681_v0, 1e-30 }
 0x269   :  { %v685_v18 = vmul.f32 %v1112_v2, %v682_v24  ;;  %vm690_vm15 = vweird.f32 %v1112_v2  ;;  %v1120_v24 = vld [vmem:[%s1844_s0 + $0x38] sm:$0xff] }
 0x26a   :  { %1113 = vrcp.f32 %v683_v4  ;;  %vm691_vm2 = vmor %vm689_vm1, %vm690_vm15  ;;  %v707_v19 = vand.u32 2147483647, %v683_v4  ;;  %v709_v59 = vand.u32 2147483648, %v683_v4  ;;  %vm703_vm12 = vweird.f32 %v683_v4 }
 0x26b   :  { %v686_v60 = vsub.f32 1.0, %v685_v18 }
 0x26c   :  { %v710_v22 = vor.u32 1.1754944e-38, %v709_v59  ;;  %vm708_vm14 = vcmp.eq.f32.partialorder %v707_v19, 8.507059e+37 }
 0x26d   :  { %v687_v6 = vmul.f32 %v1112_v2, %v686_v60 }
 0x26f   :  { %v688_v9 = vadd.f32 %v1112_v2, %v687_v6 }
 0x270   :  { %v1114_v29 = vpop.eup %1113 }
 0x271   :  { %v692_v15 = vsel %vm691_vm2, %v1112_v2, %v688_v9  ;;  %v699_v26 = vmul.f32 %v1114_v29, %v683_v4  ;;  %vm704_vm4 = vweird.f32 %v1114_v29 }
 0x272   :  { %v697_v16 = vsel %vm694_vm3, %v696_v11, %v692_v15  ;;  %vm705_vm13 = vmor %vm703_vm12, %vm704_vm4 }
 0x273   :  { %v712_v1 = vmul.f32 %v697_v16, %v674_v53  ;;  %v700_v63 = vsub.f32 1.0, %v699_v26 }
 0x275   :  { %v701_v3 = vmul.f32 %v1114_v29, %v700_v63  ;;  %v721_v20 = vperm.slane %v712_v1, 1  ;;  %v714_v44 = vperm.slane %v712_v1, 0  ;;  %v756_v31 = vperm.slane %v712_v1, 6 }
 0x276   :  { %v728_v7 = vperm.slane %v712_v1, 2  ;;  %v763_v10 = vperm.slane %v712_v1, 7  ;;  %v735_v34 = vperm.slane %v712_v1, 3  ;;  %v742_v37 = vperm.slane %v712_v1, 4 }
 0x277   :  { %v702_v21 = vadd.f32 %v1114_v29, %v701_v3  ;;  %726 = vperm.xlu0 %1040, %v721_v20   ;;  %719 = vperm.xlu1 %1039, %v714_v44   ;;  %v749_v38 = vperm.slane %v712_v1, 5 }
 0x279   :  { %v706_v25 = vsel %vm705_vm13, %v1114_v29, %v702_v21  ;;  %v1121_v29 = vld [vmem:[%s1844_s0 + $0x20] sm:$0xff] }
 0x27a   :  { %v711_v33 = vsel %vm708_vm14, %v710_v22, %v706_v25 }
 0x27b   :  { %v713_v14 = vmul.f32 %v711_v33, %v675_v56 }
 0x27d   :  { %v777_v28 = vperm.slane %v713_v14, 1  ;;  %v784_v17 = vperm.slane %v713_v14, 2  ;;  %v798_v36 = vperm.slane %v713_v14, 4  ;;  %v819_v47 = vperm.slane %v713_v14, 7 }
 0x27e   :  { %v770_v12 = vperm.slane %v713_v14, 0  ;;  %v791_v39 = vperm.slane %v713_v14, 3  ;;  %v805_v48 = vperm.slane %v713_v14, 5  ;;  %v812_v30 = vperm.slane %v713_v14, 6 }
 0x27f   :  { %782 = vperm.xlu2 %1041, %v777_v28   ;;  %761 = vperm.xlu0 %1040, %v756_v31  }
 0x280   :  { %733 = vperm.xlu1 %1039, %v728_v7  }
 0x287   :  { %768 = vperm.xlu2 %1041, %v763_v10   ;;  %789 = vperm.xlu0 %1040, %v784_v17   ;;  %v1122_v10 = vld [vmem:[%s1844_s0 + $0x28] sm:$0xff] }
 0x288   :  { %740 = vperm.xlu1 %1039, %v735_v34  }
 0x28f   :  { %803 = vperm.xlu0 %1040, %v798_v36  }
 0x290   :  { %747 = vperm.xlu1 %1039, %v742_v37  }
 0x297   :  { %824 = vperm.xlu0 %1040, %v819_v47  }
 0x298   :  { %754 = vperm.xlu1 %1039, %v749_v38  }
 0x2a0   :  { %775 = vperm.xlu1 %1039, %v770_v12  }
 0x2a8   :  { %796 = vperm.xlu1 %1039, %v791_v39  }
 0x2b0   :  { %810 = vperm.xlu1 %1039, %v805_v48  }
 0x2b8   :  { %817 = vperm.xlu1 %1039, %v812_v30  }
 0x2d9   :  { %v1754_v42 = vpop.permute.xlu2 %782 }
 0x2e1   :  { %v769_v53 = vpop.permute.xlu2 %768 }
 0x2e2   :  { %v833_v0 = vmul.f32 %v1120_v24, %v769_v53 }
 0x2e4   :  { %v891_v8 = vsel %vm40_vm0, %v833_v0, 0.0 }
 0x2e5   :  { %v892_v1 = vrot.slane %v891_v8, 4 }
 0x2e7   :  { %v893_v25 = vadd.f32 %v892_v1, %v891_v8  ;;  %v1126_v1 = vld [vmem:[%s1844_s0 + $0x60] sm:$0xff] }
 0x2e9   :  { %v720_v41 = vpop.permute.xlu1 %719  ;;  %v727_v35 = vpop.permute.xlu0 %726  ;;  %v894_v38 = vrot.slane %v893_v25, 2 }
 0x2ea   :  { %v827_v55 = vmul.f32 %v1115_v23, %v727_v35  ;;  %v826_v40 = vmul.f32 %v1116_v45, %v720_v41 }
 0x2eb   :  { %v895_v45 = vadd.f32 %v894_v38, %v893_v25  ;;  %v1129_v38 = vld [vmem:[%s1844_s0 + $0x68] sm:$0xff] }
 0x2ec   :  { %v849_v58 = vsel %vm40_vm0, %v827_v55, 0.0  ;;  %v842_v32 = vsel %vm40_vm0, %v826_v40, 0.0 }
 0x2ed   :  { %v850_v56 = vrot.slane %v849_v58, 4  ;;  %v843_v61 = vrot.slane %v842_v32, 4 }
 0x2ef   :  { %v851_v18 = vadd.f32 %v850_v56, %v849_v58  ;;  %v844_v60 = vadd.f32 %v843_v61, %v842_v32  ;;  %v1123_v58 = vld [vmem:[%s1844_s0 + $0x48] sm:$0xff]  ;;  %v896_v61 = vrot.slane %v895_v45, 1 }
 0x2f0   :  { %v835_v32 = vmul.f32 %v1123_v58, %v1754_v42 }
 0x2f1   :  { %v762_v13 = vpop.permute.xlu0 %761  ;;  %v852_v63 = vrot.slane %v851_v18, 2  ;;  %v845_v19 = vrot.slane %v844_v60, 2 }
 0x2f2   :  { %v734_v43 = vpop.permute.xlu1 %733  ;;  %v832_v62 = vmul.f32 %v1119_v57, %v762_v13  ;;  %v905_v0 = vsel %vm40_vm0, %v835_v32, 0.0 }
 0x2f3   :  { %v828_v46 = vmul.f32 %v1117_v49, %v734_v43  ;;  %v853_v33 = vadd.f32 %v852_v63, %v851_v18  ;;  %v846_v14 = vadd.f32 %v845_v19, %v844_v60 }
 0x2f4   :  { %v884_v5 = vsel %vm40_vm0, %v832_v62, 0.0 }
 0x2f5   :  { %v856_v27 = vsel %vm40_vm0, %v828_v46, 0.0  ;;  %v885_v26 = vrot.slane %v884_v5, 4  ;;  %v854_v12 = vrot.slane %v853_v33, 1  ;;  %v847_v39 = vrot.slane %v846_v14, 1 }
 0x2f6   :  { %v857_v2 = vrot.slane %v856_v27, 4 }
 0x2f7   :  { %v886_v22 = vadd.f32 %v885_v26, %v884_v5  ;;  %v855_v40 = vadd.f32 %v854_v12, %v853_v33  ;;  %v848_v49 = vadd.f32 %v847_v39, %v846_v14 }
 0x2f8   :  { %v858_v9 = vadd.f32 %v857_v2, %v856_v27  ;;  %v1125_v2 = vld [vmem:[%s1844_s0 + $0x50] sm:$0xff] }
 0x2f9   :  { %v790_v59 = vpop.permute.xlu0 %789  ;;  %v887_v36 = vrot.slane %v886_v22, 2  ;;  %v970_v57 = vsel %vm636_vm5, %v855_v40, %v848_v49 }
 0x2fa   :  { %v741_v50 = vpop.permute.xlu1 %740  ;;  %v859_v20 = vrot.slane %v858_v9, 2 }
 0x2fb   :  { %v829_v52 = vmul.f32 %v1118_v51, %v741_v50  ;;  %v888_v23 = vadd.f32 %v887_v36, %v886_v22  ;;  %v1124_v51 = vld [vmem:[%s1844_s0 + $0x40] sm:$0xff] }
 0x2fc   :  { %v860_v7 = vadd.f32 %v859_v20, %v858_v9  ;;  %v906_v9 = vrot.slane %v905_v0, 4 }
 0x2fd   :  { %v863_v54 = vsel %vm40_vm0, %v829_v52, 0.0 }
 0x2fe   :  { %v864_v4 = vrot.slane %v863_v54, 4  ;;  %v861_v30 = vrot.slane %v860_v7, 1 }
 0x300   :  { %v865_v15 = vadd.f32 %v864_v4, %v863_v54  ;;  %v862_v13 = vadd.f32 %v861_v30, %v860_v7  ;;  %v889_v54 = vrot.slane %v888_v23, 1  ;;  %v836_v4 = vmul.f32 %v1125_v2, %v790_v59  ;;  %v1127_v59 = vld [vmem:[%s1844_s0 + $0x58] sm:$0xff] }
 0x301   :  { %v804_v35 = vpop.permute.xlu0 %803 }
 0x302   :  { %v748_v6 = vpop.permute.xlu1 %747  ;;  %v866_v44 = vrot.slane %v865_v15, 2  ;;  %v971_v42 = vsel %vm638_vm6, %v862_v13, %v970_v57  ;;  %v890_v5 = vadd.f32 %v889_v54, %v888_v23  ;;  %v838_v63 = vmul.f32 %v1126_v1, %v804_v35 }
 0x303   :  { %v830_v11 = vmul.f32 %v1121_v29, %v748_v6  ;;  %v897_v29 = vadd.f32 %v896_v61, %v895_v45 }
 0x304   :  { %v867_v34 = vadd.f32 %v866_v44, %v865_v15  ;;  %v1128_v44 = vld [vmem:[%s1844_s0 + $0x78] sm:$0xff] }
 0x305   :  { %v870_v16 = vsel %vm40_vm0, %v830_v11, 0.0 }
 0x306   :  { %v871_v3 = vrot.slane %v870_v16, 4  ;;  %v868_v41 = vrot.slane %v867_v34, 1 }
 0x308   :  { %v872_v21 = vadd.f32 %v871_v3, %v870_v16  ;;  %v869_v53 = vadd.f32 %v868_v41, %v867_v34  ;;  %v912_v16 = vsel %vm40_vm0, %v836_v4, 0.0 }
 0x309   :  { %v825_v11 = vpop.permute.xlu0 %824  ;;  %v913_v33 = vrot.slane %v912_v16, 4 }
 0x30a   :  { %v873_v28 = vrot.slane %v872_v21, 2  ;;  %v755_v31 = vpop.permute.xlu1 %754  ;;  %v972_v18 = vsel %vm640_vm7, %v869_v53, %v971_v42 }
 0x30b   :  { %v831_v17 = vmul.f32 %v1122_v10, %v755_v31  ;;  %v926_v31 = vsel %vm40_vm0, %v838_v63, 0.0  ;;  %v914_v34 = vadd.f32 %v913_v33, %v912_v16 }
 0x30c   :  { %v874_v37 = vadd.f32 %v873_v28, %v872_v21  ;;  %v841_v21 = vmul.f32 %v1128_v44, %v825_v11  ;;  %v907_v28 = vadd.f32 %v906_v9, %v905_v0  ;;  %v927_v36 = vrot.slane %v926_v31, 4 }
 0x30d   :  { %v877_v47 = vsel %vm40_vm0, %v831_v17, 0.0  ;;  %v915_v35 = vrot.slane %v914_v34, 2 }
 0x30e   :  { %v878_v48 = vrot.slane %v877_v47, 4  ;;  %v875_v55 = vrot.slane %v874_v37, 1  ;;  %v947_v7 = vsel %vm40_vm0, %v841_v21, 0.0 }
 0x30f   :  { %v948_v39 = vrot.slane %v947_v7, 4 }
 0x310   :  { %v879_v43 = vadd.f32 %v878_v48, %v877_v47  ;;  %v876_v56 = vadd.f32 %v875_v55, %v874_v37  ;;  %v908_v47 = vrot.slane %v907_v28, 2 }
 0x311   :  { %v949_v45 = vadd.f32 %v948_v39, %v947_v7 }
 0x312   :  { %v880_v46 = vrot.slane %v879_v43, 2  ;;  %v776_v50 = vpop.permute.xlu1 %775  ;;  %v973_v6 = vsel %vm642_vm8, %v876_v56, %v972_v18  ;;  %v909_v55 = vadd.f32 %v908_v47, %v907_v28 }
 0x313   :  { %v834_v52 = vmul.f32 %v1124_v51, %v776_v50  ;;  %v916_v50 = vadd.f32 %v915_v35, %v914_v34 }
 0x314   :  { %v881_v27 = vadd.f32 %v880_v46, %v879_v43  ;;  %v928_v43 = vadd.f32 %v927_v36, %v926_v31  ;;  %v910_v51 = vrot.slane %v909_v55, 1 }
 0x315   :  { %v898_v24 = vsel %vm40_vm0, %v834_v52, 0.0  ;;  %v1130_v52 = vld [vmem:[%s1844_s0 + $0x70] sm:$0xff] }
 0x316   :  { %v882_v62 = vrot.slane %v881_v27, 1  ;;  %v899_v8 = vrot.slane %v898_v24, 4  ;;  %v929_v58 = vrot.slane %v928_v43, 2  ;;  %v911_v42 = vadd.f32 %v910_v51, %v909_v55 }
 0x318   :  { %v883_v60 = vadd.f32 %v882_v62, %v881_v27  ;;  %v900_v22 = vadd.f32 %v899_v8, %v898_v24  ;;  %v950_v27 = vrot.slane %v949_v45, 2  ;;  %v917_v62 = vrot.slane %v916_v50, 1 }
 0x319   :  { %v930_v24 = vadd.f32 %v929_v58, %v928_v43 }
 0x31a   :  { %v974_v15 = vsel %vm644_vm9, %v883_v60, %v973_v6  ;;  %v797_v26 = vpop.permute.xlu1 %796  ;;  %v901_v10 = vrot.slane %v900_v22, 2  ;;  %v951_v4 = vadd.f32 %v950_v27, %v949_v45  ;;  %v918_v6 = vadd.f32 %v917_v62, %v916_v50 }
 0x31b   :  { %v975_v19 = vsel %vm646_vm10, %v890_v5, %v974_v15  ;;  %v837_v3 = vmul.f32 %v1127_v59, %v797_v26  ;;  %v931_v8 = vrot.slane %v930_v24, 1 }
 0x31c   :  { %v976_v20 = vsel %vm648_vm11, %v897_v29, %v975_v19  ;;  %v902_v48 = vadd.f32 %v901_v10, %v900_v22  ;;  %v952_v15 = vrot.slane %v951_v4, 1 }
 0x31d   :  { %986 = vst.msk [vmem:[%s1848_s5] sm:$0xff] %vm40_vm0, %v976_v20  ;;  %v919_v25 = vsel %vm40_vm0, %v837_v3, 0.0  ;;  %v932_v1 = vadd.f32 %v931_v8, %v930_v24 }
 0x31e   :  { %v920_v14 = vrot.slane %v919_v25, 4  ;;  %v903_v49 = vrot.slane %v902_v48, 1  ;;  %v953_v3 = vadd.f32 %v952_v15, %v951_v4 }
 0x320   :  { %v921_v17 = vadd.f32 %v920_v14, %v919_v25  ;;  %v904_v54 = vadd.f32 %v903_v49, %v902_v48 }
 0x322   :  { %v811_v37 = vpop.permute.xlu1 %810  ;;  %v922_v30 = vrot.slane %v921_v17, 2  ;;  %v977_v18 = vsel %vm636_vm5, %v911_v42, %v904_v54 }
 0x323   :  { %v839_v12 = vmul.f32 %v1129_v38, %v811_v37  ;;  %v978_v29 = vsel %vm638_vm6, %v918_v6, %v977_v18 }
 0x324   :  { %v923_v46 = vadd.f32 %v922_v30, %v921_v17 }
 0x325   :  { %v933_v41 = vsel %vm40_vm0, %v839_v12, 0.0 }
 0x326   :  { %v934_v23 = vrot.slane %v933_v41, 4  ;;  %v924_v56 = vrot.slane %v923_v46, 1 }
 0x328   :  { %v935_v40 = vadd.f32 %v934_v23, %v933_v41  ;;  %v925_v60 = vadd.f32 %v924_v56, %v923_v46 }
 0x32a   :  { %v936_v32 = vrot.slane %v935_v40, 2  ;;  %v818_v13 = vpop.permute.xlu1 %817  ;;  %v979_v26 = vsel %vm640_vm7, %v925_v60, %v978_v29 }
 0x32b   :  { %v840_v53 = vmul.f32 %v1130_v52, %v818_v13  ;;  %v980_v19 = vsel %vm642_vm8, %v932_v1, %v979_v26 }
 0x32c   :  { %v937_v61 = vadd.f32 %v936_v32, %v935_v40 }
 0x32d   :  { %v940_v57 = vsel %vm40_vm0, %v840_v53, 0.0 }
 0x32e   :  { %v941_v0 = vrot.slane %v940_v57, 4  ;;  %v938_v5 = vrot.slane %v937_v61, 1 }
 0x330   :  { %v942_v2 = vadd.f32 %v941_v0, %v940_v57  ;;  %v939_v16 = vadd.f32 %v938_v5, %v937_v61 }
 0x332   :  { %v943_v9 = vrot.slane %v942_v2, 2  ;;  %v981_v20 = vsel %vm644_vm9, %v939_v16, %v980_v19 }
 0x334   :  { %v944_v11 = vadd.f32 %v943_v9, %v942_v2 }
 0x336   :  { %v945_v63 = vrot.slane %v944_v11, 1 }
 0x338   :  { %v946_v59 = vadd.f32 %v945_v63, %v944_v11 }
 0x33a   :  { %v982_v44 = vsel %vm646_vm10, %v946_v59, %v981_v20 }
 0x33b   :  { %v983_v21 = vsel %vm648_vm11, %v953_v3, %v982_v44 }
 0x33c   :  { %987 = vst.msk [vmem:[%s1848_s5 + $0x8] sm:$0xff] %vm40_vm0, %v983_v21 }

</bundles_post_ra>
